<compile_context>
chip_gen: v7x
topology: tpu7x:2x2x1
jax: 0.10.0
libtpu: 0.0.40
codegen_flags: <defaults>
</compile_context>

<pallas_src>
import functools
import numpy as np
import jax
import jax.numpy as jnp
from jax.experimental import pallas as pl
from jax.experimental.pallas import tpu as pltpu

EPS = 1e-5  # nn.LayerNorm default eps


def _layernorm(x, gamma, beta):
    mu = jnp.mean(x, axis=-1, keepdims=True)
    var = jnp.mean((x - mu) ** 2, axis=-1, keepdims=True)
    return (x - mu) * jax.lax.rsqrt(var + EPS) * gamma + beta


def transformer_block_kernel(v_ref, k_ref, q_ref,
                             wq_ref, wk_ref, wv_ref, wo_ref, bo_ref,
                             g1_ref, be1_ref,
                             w1_ref, bf1_ref, w2_ref, bf2_ref,
                             g2_ref, be2_ref,
                             out_ref,
                             *, nb, seq_len, heads, head_dim, embed_size):
    # One batch-block (nb batch elements, flattened with seq) per grid step.
    R = nb * seq_len

    q32 = q_ref[...]                        # (R, E) f32 — kept for the residual path
    q = q32.astype(jnp.bfloat16)
    k = k_ref[...].astype(jnp.bfloat16)
    v = v_ref[...].astype(jnp.bfloat16)

    # Fused (block-diagonal) per-head projections: three full-width bf16 MXU matmuls.
    qp = jnp.dot(q, wq_ref[...], preferred_element_type=jnp.float32)   # (R, E)
    kp = jnp.dot(k, wk_ref[...], preferred_element_type=jnp.float32)
    vp = jnp.dot(v, wv_ref[...], preferred_element_type=jnp.float32)

    scale = 1.0 / (embed_size ** 0.5)

    if nb > 1:
        # Mask so that rows of one batch element never attend to keys of another one.
        rows = jax.lax.broadcasted_iota(jnp.int32, (R, R), 0) // seq_len
        cols = jax.lax.broadcasted_iota(jnp.int32, (R, R), 1) // seq_len
        same_batch = rows == cols
    else:
        same_batch = None

    head_outs = []
    for h in range(heads):
        lo = h * head_dim
        qh = qp[:, lo:lo + head_dim].astype(jnp.bfloat16)          # (R, D)
        kh_t = kp[:, lo:lo + head_dim].T.astype(jnp.bfloat16)      # (D, R)
        vh = vp[:, lo:lo + head_dim].astype(jnp.bfloat16)          # (R, D)

        energy = jnp.dot(qh, kh_t, preferred_element_type=jnp.float32) * scale  # (R, R)
        if same_batch is not None:
            energy = jnp.where(same_batch, energy, -1e30)
        energy = energy - jnp.max(energy, axis=-1, keepdims=True)
        p = jnp.exp(energy)
        inv_l = pl.reciprocal(jnp.sum(p, axis=-1, keepdims=True), approx=True)
        attn = (p * inv_l).astype(jnp.bfloat16)

        head_outs.append(jnp.dot(attn, vh, preferred_element_type=jnp.float32))  # (R, D)

    # Single fused output projection on the concatenated heads (+ bias added once).
    concat = jnp.concatenate(head_outs, axis=-1)                                  # (R, E) f32
    attn_out = jnp.dot(concat.astype(jnp.bfloat16), wo_ref[...],
                       preferred_element_type=jnp.float32) + bo_ref[...]

    # residual + LayerNorm 1 (f32 statistics)
    x = _layernorm(attn_out + q32, g1_ref[...], be1_ref[...])

    # feed forward: Linear -> ReLU -> Linear (bf16 MXU operands, f32 accumulation)
    h1 = jnp.maximum(
        jnp.dot(x.astype(jnp.bfloat16), w1_ref[...],
                preferred_element_type=jnp.float32) + bf1_ref[...], 0.0)
    ff = jnp.dot(h1.astype(jnp.bfloat16), w2_ref[...],
                 preferred_element_type=jnp.float32) + bf2_ref[...]

    # residual + LayerNorm 2
    y = _layernorm(ff + x, g2_ref[...], be2_ref[...])
    out_ref[...] = y.astype(out_ref.dtype)


def _block_diag(w, heads):
    d = w.shape[0]
    e = d * heads
    out = jnp.zeros((e, e), w.dtype)
    for h in range(heads):
        out = out.at[h * d:(h + 1) * d, h * d:(h + 1) * d].set(w)
    return out


def _pick_batch_block(n, max_block=8):
    if n <= 1:
        return 1
    # Keep at least two grid steps (v7x megacore) while amortizing per-step overhead.
    return max(1, min(max_block, (n + 1) // 2))


def transformer_block(value, key, query, params, heads, batch_block=None):
    N, S, E = query.shape
    D = E // heads
    F = params["w1"].shape[1]

    nb = _pick_batch_block(N) if batch_block is None else batch_block
    G = -(-N // nb)                 # number of grid steps
    Np = G * nb                     # padded batch

    def pad_batch(x):
        if Np == N:
            return x
        return jnp.concatenate([x, jnp.zeros((Np - N, S, E), x.dtype)], axis=0)

    # Flatten (batch, seq) so each grid step sees one (nb*S, E) 2-D tile.
    v2 = pad_batch(value).reshape(Np * S, E)
    k2 = pad_batch(key).reshape(Np * S, E)
    q2 = pad_batch(query).reshape(Np * S, E)

    bf16 = jnp.bfloat16
    weights = [
        _block_diag(params["wq"], heads).astype(bf16),
        _block_diag(params["wk"], heads).astype(bf16),
        _block_diag(params["wv"], heads).astype(bf16),
        params["wo"].astype(bf16),
        params["bo"],
        params["g1"], params["be1"],
        params["w1"].astype(bf16), params["bf1"],
        params["w2"].astype(bf16), params["bf2"],
        params["g2"], params["be2"],
    ]

    R = nb * S
    seq_spec = lambda: pl.BlockSpec((R, E), lambda i: (i, 0))
    full_spec = lambda w: pl.BlockSpec(w.shape, lambda i: (0,) * w.ndim)

    kernel = functools.partial(transformer_block_kernel,
                               nb=nb, seq_len=S, heads=heads,
                               head_dim=D, embed_size=E)

    # Advisory cost estimate for the XLA scheduler.
    flops = (2 * Np * S * (3 * E * E + E * E + 2 * E * F)
             + 2 * G * heads * R * R * D * 2)
    transcendentals = G * heads * R * R
    bytes_accessed = (4 * (4 * Np * S * E)                       # q/k/v/out (f32)
                      + 2 * (4 * E * E + 2 * E * F)              # bf16 matmul weights
                      + 4 * (5 * E + 2 * F))                     # f32 biases / LN params

    out = pl.pallas_call(
        kernel,
        grid=(G,),
        in_specs=[seq_spec(), seq_spec(), seq_spec()] + [full_spec(w) for w in weights],
        out_specs=pl.BlockSpec((R, E), lambda i: (i, 0)),
        out_shape=jax.ShapeDtypeStruct((Np * S, E), jnp.float32),
        compiler_params=pltpu.CompilerParams(
            dimension_semantics=("parallel",),
            vmem_limit_bytes=32 * 1024 * 1024),
        cost_estimate=pl.CostEstimate(flops=int(flops),
                                      transcendentals=int(transcendentals),
                                      bytes_accessed=int(bytes_accessed)),
    )(v2, k2, q2, *weights)

    return out.reshape(Np, S, E)[:N]


def reference(value, key, query, p, heads):
    # Pure-JAX (f32) mirror of the PyTorch forward (dropout = identity).
    N, S, E = query.shape
    D = E // heads
    split = lambda x: x.reshape(N, S, heads, D)
    v = split(value) @ p["wv"]
    k = split(key) @ p["wk"]
    q = split(query) @ p["wq"]
    energy = jnp.einsum("nqhd,nkhd->nhqk", q, k)
    attn = jax.nn.softmax(energy / (E ** 0.5), axis=3)
    out = jnp.einsum("nhql,nlhd->nqhd", attn, v).reshape(N, S, E)
    out = out @ p["wo"] + p["bo"][0]
    x = _layernorm(out + query, p["g1"][0], p["be1"][0])
    ff = jnp.maximum(x @ p["w1"] + p["bf1"][0], 0.0) @ p["w2"] + p["bf2"][0]
    return _layernorm(ff + x, p["g2"][0], p["be2"][0])


def make_params(key, embed_size, heads, forward_expansion):
    D = embed_size // heads
    F = forward_expansion * embed_size
    ks = jax.random.split(key, 8)
    s = 0.05
    return {
        # Linear weights stored as (in, out); applied as x @ W.
        "wq": s * jax.random.normal(ks[0], (D, D), jnp.float32),
        "wk": s * jax.random.normal(ks[1], (D, D), jnp.float32),
        "wv": s * jax.random.normal(ks[2], (D, D), jnp.float32),
        "wo": s * jax.random.normal(ks[3], (embed_size, embed_size), jnp.float32),
        "bo": s * jax.random.normal(ks[4], (1, embed_size), jnp.float32),
        "g1": jnp.ones((1, embed_size), jnp.float32),
        "be1": jnp.zeros((1, embed_size), jnp.float32),
        "w1": s * jax.random.normal(ks[5], (embed_size, F), jnp.float32),
        "bf1": s * jax.random.normal(ks[6], (1, F), jnp.float32),
        "w2": s * jax.random.normal(ks[7], (F, embed_size), jnp.float32),
        "bf2": jnp.zeros((1, embed_size), jnp.float32),
        "g2": jnp.ones((1, embed_size), jnp.float32),
        "be2": jnp.zeros((1, embed_size), jnp.float32),
    }


if __name__ == "__main__":
    N, S, E, heads, forward_expansion = 2, 8, 32, 4, 4

    root = jax.random.PRNGKey(0)
    k_v, k_k, k_q, k_p = jax.random.split(root, 4)
    value = jax.random.normal(k_v, (N, S, E), jnp.float32)
    key_t = jax.random.normal(k_k, (N, S, E), jnp.float32)
    query = jax.random.normal(k_q, (N, S, E), jnp.float32)
    params = make_params(k_p, E, heads, forward_expansion)

    out = transformer_block(value, key_t, query, params, heads)
    out = jax.block_until_ready(out)

    ref = reference(value, key_t, query, params, heads)
    # bf16 MXU operands => slightly relaxed tolerance vs. the f32 reference.
    np.testing.assert_allclose(np.asarray(out), np.asarray(ref), rtol=3e-2, atol=3e-2)

    print("KERNEL_OK")
</pallas_src>

<mosaic_0001>
module attributes {stable_mosaic.version = 11 : i64} {
  func.func @transformer_block_kernel(%arg0: i32, %arg1: memref<8x32xf32, #tpu.memory_space<vmem>>, %arg2: memref<8x32xf32, #tpu.memory_space<vmem>>, %arg3: memref<8x32xf32, #tpu.memory_space<vmem>>, %arg4: memref<32x32xbf16, #tpu.memory_space<vmem>>, %arg5: memref<32x32xbf16, #tpu.memory_space<vmem>>, %arg6: memref<32x32xbf16, #tpu.memory_space<vmem>>, %arg7: memref<32x32xbf16, #tpu.memory_space<vmem>>, %arg8: memref<1x32xf32, #tpu.memory_space<vmem>>, %arg9: memref<1x32xf32, #tpu.memory_space<vmem>>, %arg10: memref<1x32xf32, #tpu.memory_space<vmem>>, %arg11: memref<32x128xbf16, #tpu.memory_space<vmem>>, %arg12: memref<1x128xf32, #tpu.memory_space<vmem>>, %arg13: memref<128x32xbf16, #tpu.memory_space<vmem>>, %arg14: memref<1x32xf32, #tpu.memory_space<vmem>>, %arg15: memref<1x32xf32, #tpu.memory_space<vmem>>, %arg16: memref<1x32xf32, #tpu.memory_space<vmem>>, %arg17: memref<8x32xf32, #tpu.memory_space<vmem>>) attributes {dimension_semantics = [#tpu.dimension_semantics<parallel>], iteration_bounds = array<i64: 2>, scalar_prefetch = 0 : i64, scratch_operands = 0 : i64, tpu.core_type = #tpu.core_type<tc>, window_params = [{transform_indices = @transform_0, window_bounds = array<i64: 8, 32>}, {transform_indices = @transform_1, window_bounds = array<i64: 8, 32>}, {transform_indices = @transform_2, window_bounds = array<i64: 8, 32>}, {pipeline_mode = #tpu.pipeline_mode<synchronous>, transform_indices = @transform_3, window_bounds = array<i64: 32, 32>}, {pipeline_mode = #tpu.pipeline_mode<synchronous>, transform_indices = @transform_4, window_bounds = array<i64: 32, 32>}, {pipeline_mode = #tpu.pipeline_mode<synchronous>, transform_indices = @transform_5, window_bounds = array<i64: 32, 32>}, {pipeline_mode = #tpu.pipeline_mode<synchronous>, transform_indices = @transform_6, window_bounds = array<i64: 32, 32>}, {pipeline_mode = #tpu.pipeline_mode<synchronous>, transform_indices = @transform_7, window_bounds = array<i64: 1, 32>}, {pipeline_mode = #tpu.pipeline_mode<synchronous>, transform_indices = @transform_8, window_bounds = array<i64: 1, 32>}, {pipeline_mode = #tpu.pipeline_mode<synchronous>, transform_indices = @transform_9, window_bounds = array<i64: 1, 32>}, {pipeline_mode = #tpu.pipeline_mode<synchronous>, transform_indices = @transform_10, window_bounds = array<i64: 32, 128>}, {pipeline_mode = #tpu.pipeline_mode<synchronous>, transform_indices = @transform_11, window_bounds = array<i64: 1, 128>}, {pipeline_mode = #tpu.pipeline_mode<synchronous>, transform_indices = @transform_12, window_bounds = array<i64: 128, 32>}, {pipeline_mode = #tpu.pipeline_mode<synchronous>, transform_indices = @transform_13, window_bounds = array<i64: 1, 32>}, {pipeline_mode = #tpu.pipeline_mode<synchronous>, transform_indices = @transform_14, window_bounds = array<i64: 1, 32>}, {pipeline_mode = #tpu.pipeline_mode<synchronous>, transform_indices = @transform_15, window_bounds = array<i64: 1, 32>}, {transform_indices = @transform_16, window_bounds = array<i64: 8, 32>}]} {
    %c0 = arith.constant 0 : index
    %c0_0 = arith.constant 0 : index
    %0 = vector.load %arg3[%c0, %c0_0] : memref<8x32xf32, #tpu.memory_space<vmem>>, vector<8x32xf32>
    %1 = arith.truncf %0 : vector<8x32xf32> to vector<8x32xbf16>
    %c0_1 = arith.constant 0 : index
    %c0_2 = arith.constant 0 : index
    %2 = vector.load %arg2[%c0_1, %c0_2] : memref<8x32xf32, #tpu.memory_space<vmem>>, vector<8x32xf32>
    %3 = arith.truncf %2 : vector<8x32xf32> to vector<8x32xbf16>
    %c0_3 = arith.constant 0 : index
    %c0_4 = arith.constant 0 : index
    %4 = vector.load %arg1[%c0_3, %c0_4] : memref<8x32xf32, #tpu.memory_space<vmem>>, vector<8x32xf32>
    %5 = arith.truncf %4 : vector<8x32xf32> to vector<8x32xbf16>
    %c0_5 = arith.constant 0 : index
    %c0_6 = arith.constant 0 : index
    %6 = vector.load %arg4[%c0_5, %c0_6] : memref<32x32xbf16, #tpu.memory_space<vmem>>, vector<32x32xbf16>
    %cst = arith.constant dense<0.000000e+00> : vector<8x32xf32>
    %7 = tpu.matmul %1, %6, %cst {dimension_numbers = #tpu.dot_dimension_numbers<[1], [0], [0], [1], [0, 0, 1, 1], [], []>} : vector<8x32xbf16>, vector<32x32xbf16>, vector<8x32xf32> -> vector<8x32xf32>
    %c0_7 = arith.constant 0 : index
    %c0_8 = arith.constant 0 : index
    %8 = vector.load %arg5[%c0_7, %c0_8] : memref<32x32xbf16, #tpu.memory_space<vmem>>, vector<32x32xbf16>
    %cst_9 = arith.constant dense<0.000000e+00> : vector<8x32xf32>
    %9 = tpu.matmul %3, %8, %cst_9 {dimension_numbers = #tpu.dot_dimension_numbers<[1], [0], [0], [1], [0, 0, 1, 1], [], []>} : vector<8x32xbf16>, vector<32x32xbf16>, vector<8x32xf32> -> vector<8x32xf32>
    %c0_10 = arith.constant 0 : index
    %c0_11 = arith.constant 0 : index
    %10 = vector.load %arg6[%c0_10, %c0_11] : memref<32x32xbf16, #tpu.memory_space<vmem>>, vector<32x32xbf16>
    %cst_12 = arith.constant dense<0.000000e+00> : vector<8x32xf32>
    %11 = tpu.matmul %5, %10, %cst_12 {dimension_numbers = #tpu.dot_dimension_numbers<[1], [0], [0], [1], [0, 0, 1, 1], [], []>} : vector<8x32xbf16>, vector<32x32xbf16>, vector<8x32xf32> -> vector<8x32xf32>
    %12 = vector.extract_strided_slice %7 {offsets = [0, 0], sizes = [8, 8], strides = [1, 1]} : vector<8x32xf32> to vector<8x8xf32>
    %13 = arith.truncf %12 : vector<8x8xf32> to vector<8x8xbf16>
    %14 = vector.extract_strided_slice %9 {offsets = [0, 0], sizes = [8, 8], strides = [1, 1]} : vector<8x32xf32> to vector<8x8xf32>
    %15 = tpu.transpose %14, [1, 0] : vector<8x8xf32> -> vector<8x8xf32>
    %16 = arith.truncf %15 : vector<8x8xf32> to vector<8x8xbf16>
    %17 = vector.extract_strided_slice %11 {offsets = [0, 0], sizes = [8, 8], strides = [1, 1]} : vector<8x32xf32> to vector<8x8xf32>
    %18 = arith.truncf %17 : vector<8x8xf32> to vector<8x8xbf16>
    %cst_13 = arith.constant dense<0.000000e+00> : vector<8x8xf32>
    %19 = tpu.matmul %13, %16, %cst_13 {dimension_numbers = #tpu.dot_dimension_numbers<[1], [0], [0], [1], [0, 0, 1, 1], [], []>} : vector<8x8xbf16>, vector<8x8xbf16>, vector<8x8xf32> -> vector<8x8xf32>
    %cst_14 = arith.constant 0.176776692 : f32
    %20 = vector.broadcast %cst_14 : f32 to vector<8x8xf32>
    %21 = arith.mulf %19, %20 : vector<8x8xf32>
    %cst_15 = arith.constant dense<0xFF800000> : vector<8xf32>
    %22 = vector.multi_reduction <maximumf>, %21, %cst_15 [1] : vector<8x8xf32> to vector<8xf32>
    %23 = vector.shape_cast %22 : vector<8xf32> to vector<8x1xf32>
    %24 = vector.broadcast %23 : vector<8x1xf32> to vector<8x8xf32>
    %25 = arith.subf %21, %24 : vector<8x8xf32>
    %26 = math.exp %25 : vector<8x8xf32>
    %cst_16 = arith.constant dense<0.000000e+00> : vector<8xf32>
    %27 = vector.multi_reduction <add>, %26, %cst_16 [1] : vector<8x8xf32> to vector<8xf32>
    %28 = vector.shape_cast %27 : vector<8xf32> to vector<8x1xf32>
    %29 = tpu.reciprocal %28 {approx = true} : vector<8x1xf32> -> vector<8x1xf32>
    %30 = vector.broadcast %29 : vector<8x1xf32> to vector<8x8xf32>
    %31 = arith.mulf %26, %30 : vector<8x8xf32>
    %32 = arith.truncf %31 : vector<8x8xf32> to vector<8x8xbf16>
    %cst_17 = arith.constant dense<0.000000e+00> : vector<8x8xf32>
    %33 = tpu.matmul %32, %18, %cst_17 {dimension_numbers = #tpu.dot_dimension_numbers<[1], [0], [0], [1], [0, 0, 1, 1], [], []>} : vector<8x8xbf16>, vector<8x8xbf16>, vector<8x8xf32> -> vector<8x8xf32>
    %34 = vector.extract_strided_slice %7 {offsets = [0, 8], sizes = [8, 8], strides = [1, 1]} : vector<8x32xf32> to vector<8x8xf32>
    %35 = arith.truncf %34 : vector<8x8xf32> to vector<8x8xbf16>
    %36 = vector.extract_strided_slice %9 {offsets = [0, 8], sizes = [8, 8], strides = [1, 1]} : vector<8x32xf32> to vector<8x8xf32>
    %37 = tpu.transpose %36, [1, 0] : vector<8x8xf32> -> vector<8x8xf32>
    %38 = arith.truncf %37 : vector<8x8xf32> to vector<8x8xbf16>
    %39 = vector.extract_strided_slice %11 {offsets = [0, 8], sizes = [8, 8], strides = [1, 1]} : vector<8x32xf32> to vector<8x8xf32>
    %40 = arith.truncf %39 : vector<8x8xf32> to vector<8x8xbf16>
    %cst_18 = arith.constant dense<0.000000e+00> : vector<8x8xf32>
    %41 = tpu.matmul %35, %38, %cst_18 {dimension_numbers = #tpu.dot_dimension_numbers<[1], [0], [0], [1], [0, 0, 1, 1], [], []>} : vector<8x8xbf16>, vector<8x8xbf16>, vector<8x8xf32> -> vector<8x8xf32>
    %cst_19 = arith.constant 0.176776692 : f32
    %42 = vector.broadcast %cst_19 : f32 to vector<8x8xf32>
    %43 = arith.mulf %41, %42 : vector<8x8xf32>
    %cst_20 = arith.constant dense<0xFF800000> : vector<8xf32>
    %44 = vector.multi_reduction <maximumf>, %43, %cst_20 [1] : vector<8x8xf32> to vector<8xf32>
    %45 = vector.shape_cast %44 : vector<8xf32> to vector<8x1xf32>
    %46 = vector.broadcast %45 : vector<8x1xf32> to vector<8x8xf32>
    %47 = arith.subf %43, %46 : vector<8x8xf32>
    %48 = math.exp %47 : vector<8x8xf32>
    %cst_21 = arith.constant dense<0.000000e+00> : vector<8xf32>
    %49 = vector.multi_reduction <add>, %48, %cst_21 [1] : vector<8x8xf32> to vector<8xf32>
    %50 = vector.shape_cast %49 : vector<8xf32> to vector<8x1xf32>
    %51 = tpu.reciprocal %50 {approx = true} : vector<8x1xf32> -> vector<8x1xf32>
    %52 = vector.broadcast %51 : vector<8x1xf32> to vector<8x8xf32>
    %53 = arith.mulf %48, %52 : vector<8x8xf32>
    %54 = arith.truncf %53 : vector<8x8xf32> to vector<8x8xbf16>
    %cst_22 = arith.constant dense<0.000000e+00> : vector<8x8xf32>
    %55 = tpu.matmul %54, %40, %cst_22 {dimension_numbers = #tpu.dot_dimension_numbers<[1], [0], [0], [1], [0, 0, 1, 1], [], []>} : vector<8x8xbf16>, vector<8x8xbf16>, vector<8x8xf32> -> vector<8x8xf32>
    %56 = vector.extract_strided_slice %7 {offsets = [0, 16], sizes = [8, 8], strides = [1, 1]} : vector<8x32xf32> to vector<8x8xf32>
    %57 = arith.truncf %56 : vector<8x8xf32> to vector<8x8xbf16>
    %58 = vector.extract_strided_slice %9 {offsets = [0, 16], sizes = [8, 8], strides = [1, 1]} : vector<8x32xf32> to vector<8x8xf32>
    %59 = tpu.transpose %58, [1, 0] : vector<8x8xf32> -> vector<8x8xf32>
    %60 = arith.truncf %59 : vector<8x8xf32> to vector<8x8xbf16>
    %61 = vector.extract_strided_slice %11 {offsets = [0, 16], sizes = [8, 8], strides = [1, 1]} : vector<8x32xf32> to vector<8x8xf32>
    %62 = arith.truncf %61 : vector<8x8xf32> to vector<8x8xbf16>
    %cst_23 = arith.constant dense<0.000000e+00> : vector<8x8xf32>
    %63 = tpu.matmul %57, %60, %cst_23 {dimension_numbers = #tpu.dot_dimension_numbers<[1], [0], [0], [1], [0, 0, 1, 1], [], []>} : vector<8x8xbf16>, vector<8x8xbf16>, vector<8x8xf32> -> vector<8x8xf32>
    %cst_24 = arith.constant 0.176776692 : f32
    %64 = vector.broadcast %cst_24 : f32 to vector<8x8xf32>
    %65 = arith.mulf %63, %64 : vector<8x8xf32>
    %cst_25 = arith.constant dense<0xFF800000> : vector<8xf32>
    %66 = vector.multi_reduction <maximumf>, %65, %cst_25 [1] : vector<8x8xf32> to vector<8xf32>
    %67 = vector.shape_cast %66 : vector<8xf32> to vector<8x1xf32>
    %68 = vector.broadcast %67 : vector<8x1xf32> to vector<8x8xf32>
    %69 = arith.subf %65, %68 : vector<8x8xf32>
    %70 = math.exp %69 : vector<8x8xf32>
    %cst_26 = arith.constant dense<0.000000e+00> : vector<8xf32>
    %71 = vector.multi_reduction <add>, %70, %cst_26 [1] : vector<8x8xf32> to vector<8xf32>
    %72 = vector.shape_cast %71 : vector<8xf32> to vector<8x1xf32>
    %73 = tpu.reciprocal %72 {approx = true} : vector<8x1xf32> -> vector<8x1xf32>
    %74 = vector.broadcast %73 : vector<8x1xf32> to vector<8x8xf32>
    %75 = arith.mulf %70, %74 : vector<8x8xf32>
    %76 = arith.truncf %75 : vector<8x8xf32> to vector<8x8xbf16>
    %cst_27 = arith.constant dense<0.000000e+00> : vector<8x8xf32>
    %77 = tpu.matmul %76, %62, %cst_27 {dimension_numbers = #tpu.dot_dimension_numbers<[1], [0], [0], [1], [0, 0, 1, 1], [], []>} : vector<8x8xbf16>, vector<8x8xbf16>, vector<8x8xf32> -> vector<8x8xf32>
    %78 = vector.extract_strided_slice %7 {offsets = [0, 24], sizes = [8, 8], strides = [1, 1]} : vector<8x32xf32> to vector<8x8xf32>
    %79 = arith.truncf %78 : vector<8x8xf32> to vector<8x8xbf16>
    %80 = vector.extract_strided_slice %9 {offsets = [0, 24], sizes = [8, 8], strides = [1, 1]} : vector<8x32xf32> to vector<8x8xf32>
    %81 = tpu.transpose %80, [1, 0] : vector<8x8xf32> -> vector<8x8xf32>
    %82 = arith.truncf %81 : vector<8x8xf32> to vector<8x8xbf16>
    %83 = vector.extract_strided_slice %11 {offsets = [0, 24], sizes = [8, 8], strides = [1, 1]} : vector<8x32xf32> to vector<8x8xf32>
    %84 = arith.truncf %83 : vector<8x8xf32> to vector<8x8xbf16>
    %cst_28 = arith.constant dense<0.000000e+00> : vector<8x8xf32>
    %85 = tpu.matmul %79, %82, %cst_28 {dimension_numbers = #tpu.dot_dimension_numbers<[1], [0], [0], [1], [0, 0, 1, 1], [], []>} : vector<8x8xbf16>, vector<8x8xbf16>, vector<8x8xf32> -> vector<8x8xf32>
    %cst_29 = arith.constant 0.176776692 : f32
    %86 = vector.broadcast %cst_29 : f32 to vector<8x8xf32>
    %87 = arith.mulf %85, %86 : vector<8x8xf32>
    %cst_30 = arith.constant dense<0xFF800000> : vector<8xf32>
    %88 = vector.multi_reduction <maximumf>, %87, %cst_30 [1] : vector<8x8xf32> to vector<8xf32>
    %89 = vector.shape_cast %88 : vector<8xf32> to vector<8x1xf32>
    %90 = vector.broadcast %89 : vector<8x1xf32> to vector<8x8xf32>
    %91 = arith.subf %87, %90 : vector<8x8xf32>
    %92 = math.exp %91 : vector<8x8xf32>
    %cst_31 = arith.constant dense<0.000000e+00> : vector<8xf32>
    %93 = vector.multi_reduction <add>, %92, %cst_31 [1] : vector<8x8xf32> to vector<8xf32>
    %94 = vector.shape_cast %93 : vector<8xf32> to vector<8x1xf32>
    %95 = tpu.reciprocal %94 {approx = true} : vector<8x1xf32> -> vector<8x1xf32>
    %96 = vector.broadcast %95 : vector<8x1xf32> to vector<8x8xf32>
    %97 = arith.mulf %92, %96 : vector<8x8xf32>
    %98 = arith.truncf %97 : vector<8x8xf32> to vector<8x8xbf16>
    %cst_32 = arith.constant dense<0.000000e+00> : vector<8x8xf32>
    %99 = tpu.matmul %98, %84, %cst_32 {dimension_numbers = #tpu.dot_dimension_numbers<[1], [0], [0], [1], [0, 0, 1, 1], [], []>} : vector<8x8xbf16>, vector<8x8xbf16>, vector<8x8xf32> -> vector<8x8xf32>
    %100 = tpu.concatenate %33, %55, %77, %99 in 1 : vector<8x8xf32>, vector<8x8xf32>, vector<8x8xf32>, vector<8x8xf32> -> vector<8x32xf32>
    %101 = arith.truncf %100 : vector<8x32xf32> to vector<8x32xbf16>
    %c0_33 = arith.constant 0 : index
    %c0_34 = arith.constant 0 : index
    %102 = vector.load %arg7[%c0_33, %c0_34] : memref<32x32xbf16, #tpu.memory_space<vmem>>, vector<32x32xbf16>
    %cst_35 = arith.constant dense<0.000000e+00> : vector<8x32xf32>
    %103 = tpu.matmul %101, %102, %cst_35 {dimension_numbers = #tpu.dot_dimension_numbers<[1], [0], [0], [1], [0, 0, 1, 1], [], []>} : vector<8x32xbf16>, vector<32x32xbf16>, vector<8x32xf32> -> vector<8x32xf32>
    %c0_36 = arith.constant 0 : index
    %c0_37 = arith.constant 0 : index
    %104 = vector.load %arg8[%c0_36, %c0_37] : memref<1x32xf32, #tpu.memory_space<vmem>>, vector<1x32xf32>
    %105 = vector.broadcast %104 : vector<1x32xf32> to vector<8x32xf32>
    %106 = arith.addf %103, %105 : vector<8x32xf32>
    %107 = arith.addf %106, %0 : vector<8x32xf32>
    %c0_38 = arith.constant 0 : index
    %c0_39 = arith.constant 0 : index
    %108 = vector.load %arg9[%c0_38, %c0_39] : memref<1x32xf32, #tpu.memory_space<vmem>>, vector<1x32xf32>
    %c0_40 = arith.constant 0 : index
    %c0_41 = arith.constant 0 : index
    %109 = vector.load %arg10[%c0_40, %c0_41] : memref<1x32xf32, #tpu.memory_space<vmem>>, vector<1x32xf32>
    %cst_42 = arith.constant dense<0.000000e+00> : vector<8xf32>
    %110 = vector.multi_reduction <add>, %107, %cst_42 [1] : vector<8x32xf32> to vector<8xf32>
    %111 = vector.shape_cast %110 : vector<8xf32> to vector<8x1xf32>
    %cst_43 = arith.constant 3.200000e+01 : f32
    %112 = vector.broadcast %cst_43 : f32 to vector<8x1xf32>
    %113 = arith.divf %111, %112 : vector<8x1xf32>
    %114 = vector.broadcast %113 : vector<8x1xf32> to vector<8x32xf32>
    %115 = arith.subf %107, %114 : vector<8x32xf32>
    %116 = arith.mulf %115, %115 : vector<8x32xf32>
    %cst_44 = arith.constant dense<0.000000e+00> : vector<8xf32>
    %117 = vector.multi_reduction <add>, %116, %cst_44 [1] : vector<8x32xf32> to vector<8xf32>
    %118 = vector.shape_cast %117 : vector<8xf32> to vector<8x1xf32>
    %cst_45 = arith.constant 3.200000e+01 : f32
    %119 = vector.broadcast %cst_45 : f32 to vector<8x1xf32>
    %120 = arith.divf %118, %119 : vector<8x1xf32>
    %121 = vector.broadcast %113 : vector<8x1xf32> to vector<8x32xf32>
    %122 = arith.subf %107, %121 : vector<8x32xf32>
    %cst_46 = arith.constant 9.99999974E-6 : f32
    %123 = vector.broadcast %cst_46 : f32 to vector<8x1xf32>
    %124 = arith.addf %120, %123 : vector<8x1xf32>
    %125 = math.rsqrt %124 : vector<8x1xf32>
    %126 = vector.broadcast %125 : vector<8x1xf32> to vector<8x32xf32>
    %127 = arith.mulf %122, %126 : vector<8x32xf32>
    %128 = vector.broadcast %108 : vector<1x32xf32> to vector<8x32xf32>
    %129 = arith.mulf %127, %128 : vector<8x32xf32>
    %130 = vector.broadcast %109 : vector<1x32xf32> to vector<8x32xf32>
    %131 = arith.addf %129, %130 : vector<8x32xf32>
    %132 = arith.truncf %131 : vector<8x32xf32> to vector<8x32xbf16>
    %c0_47 = arith.constant 0 : index
    %c0_48 = arith.constant 0 : index
    %133 = vector.load %arg11[%c0_47, %c0_48] : memref<32x128xbf16, #tpu.memory_space<vmem>>, vector<32x128xbf16>
    %cst_49 = arith.constant dense<0.000000e+00> : vector<8x128xf32>
    %134 = tpu.matmul %132, %133, %cst_49 {dimension_numbers = #tpu.dot_dimension_numbers<[1], [0], [0], [1], [0, 0, 1, 1], [], []>} : vector<8x32xbf16>, vector<32x128xbf16>, vector<8x128xf32> -> vector<8x128xf32>
    %c0_50 = arith.constant 0 : index
    %c0_51 = arith.constant 0 : index
    %135 = vector.load %arg12[%c0_50, %c0_51] : memref<1x128xf32, #tpu.memory_space<vmem>>, vector<1x128xf32>
    %136 = vector.broadcast %135 : vector<1x128xf32> to vector<8x128xf32>
    %137 = arith.addf %134, %136 : vector<8x128xf32>
    %cst_52 = arith.constant 0.000000e+00 : f32
    %138 = vector.broadcast %cst_52 : f32 to vector<8x128xf32>
    %139 = arith.maximumf %137, %138 : vector<8x128xf32>
    %140 = arith.truncf %139 : vector<8x128xf32> to vector<8x128xbf16>
    %c0_53 = arith.constant 0 : index
    %c0_54 = arith.constant 0 : index
    %141 = vector.load %arg13[%c0_53, %c0_54] : memref<128x32xbf16, #tpu.memory_space<vmem>>, vector<128x32xbf16>
    %cst_55 = arith.constant dense<0.000000e+00> : vector<8x32xf32>
    %142 = tpu.matmul %140, %141, %cst_55 {dimension_numbers = #tpu.dot_dimension_numbers<[1], [0], [0], [1], [0, 0, 1, 1], [], []>} : vector<8x128xbf16>, vector<128x32xbf16>, vector<8x32xf32> -> vector<8x32xf32>
    %c0_56 = arith.constant 0 : index
    %c0_57 = arith.constant 0 : index
    %143 = vector.load %arg14[%c0_56, %c0_57] : memref<1x32xf32, #tpu.memory_space<vmem>>, vector<1x32xf32>
    %144 = vector.broadcast %143 : vector<1x32xf32> to vector<8x32xf32>
    %145 = arith.addf %142, %144 : vector<8x32xf32>
    %146 = arith.addf %145, %131 : vector<8x32xf32>
    %c0_58 = arith.constant 0 : index
    %c0_59 = arith.constant 0 : index
    %147 = vector.load %arg15[%c0_58, %c0_59] : memref<1x32xf32, #tpu.memory_space<vmem>>, vector<1x32xf32>
    %c0_60 = arith.constant 0 : index
    %c0_61 = arith.constant 0 : index
    %148 = vector.load %arg16[%c0_60, %c0_61] : memref<1x32xf32, #tpu.memory_space<vmem>>, vector<1x32xf32>
    %cst_62 = arith.constant dense<0.000000e+00> : vector<8xf32>
    %149 = vector.multi_reduction <add>, %146, %cst_62 [1] : vector<8x32xf32> to vector<8xf32>
    %150 = vector.shape_cast %149 : vector<8xf32> to vector<8x1xf32>
    %cst_63 = arith.constant 3.200000e+01 : f32
    %151 = vector.broadcast %cst_63 : f32 to vector<8x1xf32>
    %152 = arith.divf %150, %151 : vector<8x1xf32>
    %153 = vector.broadcast %152 : vector<8x1xf32> to vector<8x32xf32>
    %154 = arith.subf %146, %153 : vector<8x32xf32>
    %155 = arith.mulf %154, %154 : vector<8x32xf32>
    %cst_64 = arith.constant dense<0.000000e+00> : vector<8xf32>
    %156 = vector.multi_reduction <add>, %155, %cst_64 [1] : vector<8x32xf32> to vector<8xf32>
    %157 = vector.shape_cast %156 : vector<8xf32> to vector<8x1xf32>
    %cst_65 = arith.constant 3.200000e+01 : f32
    %158 = vector.broadcast %cst_65 : f32 to vector<8x1xf32>
    %159 = arith.divf %157, %158 : vector<8x1xf32>
    %160 = vector.broadcast %152 : vector<8x1xf32> to vector<8x32xf32>
    %161 = arith.subf %146, %160 : vector<8x32xf32>
    %cst_66 = arith.constant 9.99999974E-6 : f32
    %162 = vector.broadcast %cst_66 : f32 to vector<8x1xf32>
    %163 = arith.addf %159, %162 : vector<8x1xf32>
    %164 = math.rsqrt %163 : vector<8x1xf32>
    %165 = vector.broadcast %164 : vector<8x1xf32> to vector<8x32xf32>
    %166 = arith.mulf %161, %165 : vector<8x32xf32>
    %167 = vector.broadcast %147 : vector<1x32xf32> to vector<8x32xf32>
    %168 = arith.mulf %166, %167 : vector<8x32xf32>
    %169 = vector.broadcast %148 : vector<1x32xf32> to vector<8x32xf32>
    %170 = arith.addf %168, %169 : vector<8x32xf32>
    %c0_67 = arith.constant 0 : index
    %c0_68 = arith.constant 0 : index
    %171 = vector.load %arg17[%c0_67, %c0_68] : memref<8x32xf32, #tpu.memory_space<vmem>>, vector<8x32xf32>
    tpu.vector_store %arg17[%c0_67, %c0_68], %170 {strides = array<i32>} : memref<8x32xf32, #tpu.memory_space<vmem>>, vector<8x32xf32>,
    return
  }
  func.func @transform_0(%arg0: i32) -> (i32, i32) {
    %c0_i32 = arith.constant 0 : i32
    %c0_i32_0 = arith.constant 0 : i32
    return %arg0, %c0_i32 : i32, i32
  }
  func.func @transform_1(%arg0: i32) -> (i32, i32) {
    %c0_i32 = arith.constant 0 : i32
    %c0_i32_0 = arith.constant 0 : i32
    return %arg0, %c0_i32 : i32, i32
  }
  func.func @transform_2(%arg0: i32) -> (i32, i32) {
    %c0_i32 = arith.constant 0 : i32
    %c0_i32_0 = arith.constant 0 : i32
    return %arg0, %c0_i32 : i32, i32
  }
  func.func @transform_3(%arg0: i32) -> (i32, i32) {
    %c0_i32 = arith.constant 0 : i32
    %c0_i32_0 = arith.constant 0 : i32
    %c0_i32_1 = arith.constant 0 : i32
    return %c0_i32, %c0_i32_0 : i32, i32
  }
  func.func @transform_4(%arg0: i32) -> (i32, i32) {
    %c0_i32 = arith.constant 0 : i32
    %c0_i32_0 = arith.constant 0 : i32
    %c0_i32_1 = arith.constant 0 : i32
    return %c0_i32, %c0_i32_0 : i32, i32
  }
  func.func @transform_5(%arg0: i32) -> (i32, i32) {
    %c0_i32 = arith.constant 0 : i32
    %c0_i32_0 = arith.constant 0 : i32
    %c0_i32_1 = arith.constant 0 : i32
    return %c0_i32, %c0_i32_0 : i32, i32
  }
  func.func @transform_6(%arg0: i32) -> (i32, i32) {
    %c0_i32 = arith.constant 0 : i32
    %c0_i32_0 = arith.constant 0 : i32
    %c0_i32_1 = arith.constant 0 : i32
    return %c0_i32, %c0_i32_0 : i32, i32
  }
  func.func @transform_7(%arg0: i32) -> (i32, i32) {
    %c0_i32 = arith.constant 0 : i32
    %c0_i32_0 = arith.constant 0 : i32
    %c0_i32_1 = arith.constant 0 : i32
    return %c0_i32, %c0_i32_0 : i32, i32
  }
  func.func @transform_8(%arg0: i32) -> (i32, i32) {
    %c0_i32 = arith.constant 0 : i32
    %c0_i32_0 = arith.constant 0 : i32
    %c0_i32_1 = arith.constant 0 : i32
    return %c0_i32, %c0_i32_0 : i32, i32
  }
  func.func @transform_9(%arg0: i32) -> (i32, i32) {
    %c0_i32 = arith.constant 0 : i32
    %c0_i32_0 = arith.constant 0 : i32
    %c0_i32_1 = arith.constant 0 : i32
    return %c0_i32, %c0_i32_0 : i32, i32
  }
  func.func @transform_10(%arg0: i32) -> (i32, i32) {
    %c0_i32 = arith.constant 0 : i32
    %c0_i32_0 = arith.constant 0 : i32
    %c0_i32_1 = arith.constant 0 : i32
    return %c0_i32, %c0_i32_0 : i32, i32
  }
  func.func @transform_11(%arg0: i32) -> (i32, i32) {
    %c0_i32 = arith.constant 0 : i32
    %c0_i32_0 = arith.constant 0 : i32
    %c0_i32_1 = arith.constant 0 : i32
    return %c0_i32, %c0_i32_0 : i32, i32
  }
  func.func @transform_12(%arg0: i32) -> (i32, i32) {
    %c0_i32 = arith.constant 0 : i32
    %c0_i32_0 = arith.constant 0 : i32
    %c0_i32_1 = arith.constant 0 : i32
    return %c0_i32, %c0_i32_0 : i32, i32
  }
  func.func @transform_13(%arg0: i32) -> (i32, i32) {
    %c0_i32 = arith.constant 0 : i32
    %c0_i32_0 = arith.constant 0 : i32
    %c0_i32_1 = arith.constant 0 : i32
    return %c0_i32, %c0_i32_0 : i32, i32
  }
  func.func @transform_14(%arg0: i32) -> (i32, i32) {
    %c0_i32 = arith.constant 0 : i32
    %c0_i32_0 = arith.constant 0 : i32
    %c0_i32_1 = arith.constant 0 : i32
    return %c0_i32, %c0_i32_0 : i32, i32
  }
  func.func @transform_15(%arg0: i32) -> (i32, i32) {
    %c0_i32 = arith.constant 0 : i32
    %c0_i32_0 = arith.constant 0 : i32
    %c0_i32_1 = arith.constant 0 : i32
    return %c0_i32, %c0_i32_0 : i32, i32
  }
  func.func @transform_16(%arg0: i32) -> (i32, i32) {
    %c0_i32 = arith.constant 0 : i32
    %c0_i32_0 = arith.constant 0 : i32
    return %arg0, %c0_i32 : i32, i32
  }
}

</mosaic_0001>

<bundles_post_ra>
// kernel: tpu_custom_call.1
= control target key start
LH: loop header
LB: loop body
LE: loop exit
PB: predicated region body
PF: predicated region fallthrough
CT: control target
= control target key end

     0   :  { %s2770_s0 = inlined_call_operand.vmem [shape: f32[16,32], index: 0, kind: input, shape index: {}]   ;;  %s2771_s1 = inlined_call_operand.vmem [shape: f32[16,32], index: 1, kind: input, shape index: {}]   ;;  %s2772_s2 = inlined_call_operand.vmem [shape: f32[16,32], index: 2, kind: input, shape index: {}]   ;;  %s2773_s3 = inlined_call_operand.vmem [shape: bf16[32,32], index: 3, kind: input, shape index: {}]   ;;  %s2774_s4 = inlined_call_operand.vmem [shape: bf16[32,32], index: 4, kind: input, shape index: {}]   ;;  %s2775_s5 = inlined_call_operand.hbm [shape: bf16[32,32], index: 5, kind: input, shape index: {}]   ;;  %s2776_s6 = inlined_call_operand.hbm [shape: bf16[32,32], index: 6, kind: input, shape index: {}]   ;;  %s2777_s7 = inlined_call_operand.vmem [shape: f32[1,32], index: 7, kind: input, shape index: {}]   ;;  %s2778_s8 = inlined_call_operand.vmem [shape: f32[1,32], index: 8, kind: input, shape index: {}]   ;;  %s2779_s9 = inlined_call_operand.hbm [shape: f32[1,32], index: 9, kind: input, shape index: {}]   ;;  %s2780_s10 = inlined_call_operand.vmem [shape: bf16[32,128], index: 10, kind: input, shape index: {}]   ;;  %s2781_s11 = inlined_call_operand.vmem [shape: f32[1,128], index: 11, kind: input, shape index: {}]   ;;  %s2782_s12 = inlined_call_operand.vmem [shape: bf16[128,32], index: 12, kind: input, shape index: {}]   ;;  %s2783_s13 = inlined_call_operand.vmem [shape: f32[1,32], index: 13, kind: input, shape index: {}]   ;;  %s2784_s14 = inlined_call_operand.vmem [shape: f32[1,32], index: 14, kind: input, shape index: {}]   ;;  %s2785_s15 = inlined_call_operand.vmem [shape: f32[1,32], index: 15, kind: input, shape index: {}]   ;;  %s2786_s16 = inlined_call_operand.hbm [shape: f32[16,32], index: 16, kind: output, shape index: {}]  }
   0x1   :  { %2800 = sst [smem:[#allocation20_spill]] %s2770_s0 }
   0x2   :  { %2801 = sst [smem:[#allocation21_spill]] %s2784_s14 }
   0x3   :  { %2802 = sst [smem:[#allocation22_spill]] %s2785_s15 }
   0x4   :  { %2803 = sst [smem:[#allocation23_spill]] %s2786_s16 }
   0x5   :  { %21 = vsyncpa [#allocation3], 0 }
   0x6   :  { %22 = vsyncpa [#allocation6], 0 }
   0x7   :  { %23 = vsyncpa [#allocation4], 0 }
   0x8   :  { %25 = vsyncpa [#allocation4 + $0x1], 0  ;;  %s2396_s21 = smov 0   ;;  %s2398_s22 = smov 0  }
   0x9   :  { %s2400_s23 = smov 0   ;;  %s2402_s24 = smov 0  }
   0xa LB: > { %2804 = sst [smem:[#allocation12_spill]] %s2283_s21  ;;  %s2417_s25 = sadd.s32 4294967295, %s2295_s24   ;;  %s2295_s24 = sphi %s2402_s24, %s2833_s24   ;;  %s2291_s23 = sphi %s2400_s23, %s2836_s23   ;;  %s2287_s22 = sphi %s2398_s22, %s2835_s22   ;;  %s2283_s21 = sphi %s2396_s21, %s2834_s21  }
   0xb   : > { %2805 = sst [smem:[#allocation13_spill]] %s2287_s22  ;;  %s1812_s26 = sadd.s32 4294967294, %s2295_s24  }
   0xc   : > { %2806 = sst [smem:[#allocation14_spill]] %s2291_s23  ;;  %s2421_s27 = sadd.s32 1, %s2295_s24  }
   0xd   : > { %2807 = sst [smem:[#allocation15_spill]] %s2295_s24  ;;  %s389_s28 = sadd.s32 1, %s2291_s23 }
   0xe   : > { %2808 = sst [smem:[#allocation16_spill]] %s2421_s27  ;;  %s386_s29 = ssub.s32 %s2295_s24, %s2421_s27 }
   0xf   : > { %p399_p0 = scmp.ne.s32.totalorder %s2291_s23, %s2287_s22  ;;  %p387_p1 = scmp.eq.s32.totalorder %s386_s29, 0 }
  0x10   : > { %p400_p2 = scmp.eq.s32.totalorder %s2417_s25, 1  ;;  %p405_p3 = scmp.ne.s32.totalorder %s2287_s22, %s2283_s21 }
  0x11   : > { %p406_p4 = scmp.eq.s32.totalorder %s1812_s26, 1  ;;  %p1813_p7 = scmp.ge.s32.totalorder %s2295_s24, 1 }
  0x12   : > { %s2432_s30 = scalar_select %p387_p1, %s2291_s23, %s389_s28  }
  0x13   : > { %p2434_p5 = por %p400_p2, %p399_p0  ;;  %p2438_p6 = por %p406_p4, %p405_p3 }
  0x14   : > { %2809 = sst [smem:[#allocation17_spill]] %s2432_s30  ;;  %p413_p8 = scmp.lt.s32.totalorder %s2295_s24, 3 }
  0x15   : > { %s2810_s0 = scalar_select %p2434_p5, 1, 0 }
  0x16   : > { %s2812_s17 = scalar_select %p2438_p6, 1, 0 }
  0x17   : > { %2811 = sst [smem:[#allocation18_spill]] %s2810_s0  ;;  %p2794_p9 = scmp.eq.s32.totalorder %s2417_s25, 0 }
  0x18   : > { %2813 = sst [smem:[#allocation19_spill]] %s2812_s17  ;;  %p2445_p10 = pnand %p1813_p7, %p413_p8 }
  0x19   : > { %s2297_s19 = smov [#allocation5]   ;;  %s2298_s28 = smov [#allocation2]  }
  0x1a   : > { %s2814_s18 = scalar_select %p2445_p10, 1, 0 }
  0x1b   : > { %p2030_p11 = pneg %p2445_p10  ;;  %s444_s20 = sshll.u32 %s2297_s19, 4  ;;  %s2451_s20 = int_to_ptr.vmem [resolvable:$true] %s444_s20 }
  0x1c   : > { %s431_s29 = sshll.u32 %s2298_s28, 4  ;;  %s2299_s30 = smov [#allocation7]   ;;  %s2459_s29 = int_to_ptr.vmem [resolvable:$true] %s431_s29 }
  0x1d   : > { %p2455_p12 = pnand %p2794_p9, %p2030_p11  ;;  %s2461_s23 = sshll.u32 %s2299_s30, 4  ;;  %s465_s23 = int_to_ptr.vmem [resolvable:$true] %s2461_s23 }
  0x1e   : > { %s2141_s21 = scalar_lea.hbm %s2776_s6, 256 }
  0x1f   : > { %p2142_p13 = scmp.ne.s32.totalorder %s2776_s6, %s2141_s21  ;;  %p2471_p0 = pneg %p2455_p12 }
  0x20   : > { %p2148_p3 = scmp.lt.u32.totalorder %s2141_s21, %s2776_s6 }
  0x21   : > { %p2144_p1 = pnand %p2471_p0, %p2142_p13 }
  0x23   : > { %p2145_p2 = pneg %p2144_p1 }
  0x25   : > { %p2150_p4 = pnand %p2148_p3, %p2145_p2 }
  0x27   : > { %2153 = shalt.err (!%p2150_p4)
}
  0x28   : > { %s2154_s24 = scalar_lea.vmem %s2451_s20, 256  ;;  %p2162_p9 = scmp.lt.s32.totalorder %s2451_s20, %s2451_s20 }
  0x29   : > { %p2155_p7 = scmp.ne.s32.totalorder %s2451_s20, %s2154_s24  ;;  %p2163_p6 = scmp.lt.s32.totalorder %s2154_s24, %s2154_s24 }
  0x2b   : > { %p2157_p8 = pnand %p2155_p7, %p2471_p0  ;;  %p2164_p13 = por %p2163_p6, %p2162_p9 }
  0x2d   : > { %p2158_p11 = pneg %p2157_p8 }
  0x2f   : > { %p2165_p1 = pnand %p2164_p13, %p2158_p11 }
  0x31   : > { %2168 = shalt.err (!%p2165_p1)
}
  0x32   : > { %s2300_s27 = smov 64   ;;  %s2301_s21 = smov 4  }
  0x33   : > { %2036 = dma.hbm_to_vmem [thread:$0]  (!%p2455_p12), %s2776_s6, 256, %s2451_s20, [#allocation6], %s2300_s27, %s2300_s27, %s2301_s21  }
  0x34   : > { %s2169_s15 = scalar_lea.hbm %s2775_s5, 256 }
  0x35   : > { %p2170_p6 = scmp.ne.s32.totalorder %s2775_s5, %s2169_s15  ;;  %p2176_p3 = scmp.lt.u32.totalorder %s2169_s15, %s2775_s5 }
  0x37   : > { %p2172_p9 = pnand %p2170_p6, %p2471_p0 }
  0x39   : > { %p2173_p2 = pneg %p2172_p9 }
  0x3b   : > { %p2178_p4 = pnand %p2176_p3, %p2173_p2 }
  0x3d   : > { %2181 = shalt.err (!%p2178_p4)
}
  0x3e   : > { %s2182_s20 = scalar_lea.vmem %s2459_s29, 256  ;;  %p2190_p13 = scmp.lt.s32.totalorder %s2459_s29, %s2459_s29 }
  0x3f   : > { %p2183_p7 = scmp.ne.s32.totalorder %s2459_s29, %s2182_s20  ;;  %p2191_p1 = scmp.lt.s32.totalorder %s2182_s20, %s2182_s20 }
  0x41   : > { %p2185_p8 = pnand %p2183_p7, %p2471_p0  ;;  %p2192_p6 = por %p2191_p1, %p2190_p13 }
  0x43   : > { %p2186_p11 = pneg %p2185_p8 }
  0x45   : > { %p2193_p9 = pnand %p2192_p6, %p2186_p11 }
  0x47   : > { %2196 = shalt.err (!%p2193_p9)
}
  0x48   : > { %2033 = dma.hbm_to_vmem [thread:$0]  (!%p2455_p12), %s2775_s5, 256, %s2459_s29, [#allocation3], %s2300_s27, %s2300_s27, %s2301_s21  }
  0x49   : > { %s2197_s17 = scalar_lea.hbm %s2779_s9, 16 }
  0x4a   : > { %p2198_p2 = scmp.ne.s32.totalorder %s2779_s9, %s2197_s17  ;;  %p2204_p7 = scmp.lt.u32.totalorder %s2197_s17, %s2779_s9 }
  0x4c   : > { %p2200_p3 = pnand %p2198_p2, %p2471_p0 }
  0x4e   : > { %p2201_p4 = pneg %p2200_p3 }
  0x50   : > { %p2206_p8 = pnand %p2204_p7, %p2201_p4 }
  0x52   : > { %2209 = shalt.err (!%p2206_p8)
}
  0x53   : > { %s2210_s20 = scalar_lea.vmem %s465_s23, 16  ;;  %s2217_s29 = scalar_lea.vmem %s465_s23, 32 }
  0x54   : > { %p2211_p11 = scmp.ne.s32.totalorder %s465_s23, %s2210_s20  ;;  %p2218_p6 = scmp.lt.s32.totalorder %s465_s23, %s465_s23 }
  0x55   : > { %p2219_p9 = scmp.lt.s32.totalorder %s2217_s29, %s2210_s20 }
  0x56   : > { %p2213_p13 = pnand %p2211_p11, %p2471_p0 }
  0x57   : > { %p2220_p5 = por %p2219_p9, %p2218_p6 }
  0x58   : > { %p2214_p1 = pneg %p2213_p13 }
  0x5a   : > { %p2221_p10 = pnand %p2220_p5, %p2214_p1 }
  0x5c   : > { %2224 = shalt.err (!%p2221_p10)
}
  0x5d   : > { %2039 = dma.hbm_to_vmem [thread:$0]  (!%p2455_p12), %s2779_s9, 16, %s465_s23, [#allocation6]  }
  0x5e   : > { %p2817_p2 = scmp.ne.s32.totalorder %s2814_s18, 0 }
  0x5f   : > { %p2818_p3 = scmp.eq.s32.totalorder (!%p2817_p2), %s2417_s25, 0 }
  0x60   : > { %516 = sbr.rel (%p2817_p2) target bundleno = 2805 (0xaf5), region = 84 }
  0x67   : > { %2270 = dma.done.wait (%p2818_p3), [#allocation3], 256   ;;  %p2819_p0 = pmov %p2818_p3 }
  0x69   : > { %2272 = vsyncadd (%p2819_p0), [#allocation3], 4294967040  ;;  %p2820_p4 = pmov %p2819_p0 }
  0x6a   : > { %p2821_p5 = pmov %p2819_p0 }
  0x6b   : > { %2274 = dma.done.wait (%p2820_p4), [#allocation6], 272  }
  0x6c   : > { %2276 = vsyncadd (%p2821_p5), [#allocation6], 4294967024  ;;  %p581_p10 = scmp.lt.s32.totalorder %s2417_s25, 1  ;;  %v2302_v0 = vmov 0.0   ;;  %vm2303_vm0 = vmmov 0   ;;  %v2103_v1 = vld [vmem:[%s2773_s3] sm:$0xff]  }
  0x6d   : > { %1908 = vmatprep.subr.bf16.mxu0 %v2302_v0  ;;  %1912 = vmatprep.mubr.msk.bf16.mxu0 %vm2303_vm0, %v2302_v0  ;;  %v2104_v2 = vld [vmem:[%s2773_s3 + $0x8] sm:$0xff]   ;;  %vm616_vm1 = vcmask 261120   ;;  %v2105_v4 = vld [vmem:[%s2774_s4] sm:$0xff]   ;;  %s2304_s21 = smov 120   ;;  %s2306_s18 = smov 112   ;;  %vm817_vm2 = vcmask 1043456  }
  0x6e   : > { %s582_s16 = scalar_select %p581_p10, %s2417_s25, 1  ;;  %1932 = vmatprep.subr.bf16.mxu1 %v2302_v0  ;;  %1934 = vmatprep.mubr.msk.bf16.mxu1 %vm2303_vm0, %v2302_v0  ;;  %v2106_v6 = vld [vmem:[%s2774_s4 + $0x8] sm:$0xff]   ;;  %v2107_v23 = vld [vmem:[#allocation2] sm:$0xff]   ;;  %vm813_vm3 = vcmask 64512   ;;  %vm1371_vm4 = vcmask 130048   ;;  %vm1373_vm5 = vcmask 195584  }
  0x6f   : > { %1909 = vmatpush3.bf16.msra.mxu0 %v2103_v1  ;;  %s2822_s15 = sld [smem:[#allocation20_spill]]  ;;  %v2108_v24 = vld [vmem:[#allocation2 + $0x8] sm:$0xff]   ;;  %s2308_s0 = smov 16  }
  0x70   : > { %s2552_s23 = sshll.u32 %s582_s16, 3  ;;  %1910 = vmatprep.subr.bf16.mxu0 %v2302_v0  ;;  %s2305_s16 = smov 104  }
  0x71   : > { %s592_s14 = scalar_lea.vmem %s2772_s2, %s2552_s23  ;;  %s588_s20 = scalar_lea.vmem %s2771_s1, %s2552_s23 }
  0x72   : > { %v2564_v3 = vld [vmem:[%s592_s14] sm:$0xff]  ;;  %s2309_s17 = smov 24   ;;  %s2823_s14 = sld [smem:[#allocation13_spill]] }
  0x73   : > { %v595_v5 = vpack.c.bf16 %v2564_v3, %v2564_v3  ;;  %1911 = vmatpush3.bf16.msra.mxu0 %v2104_v2  ;;  %v596_v7 = vld [vmem:[%s588_s20] sm:$0xff]  ;;  %s2825_s19 = sld [smem:[#allocation21_spill]]  ;;  %s2826_s24 = sld [smem:[#allocation22_spill]] }
  0x74   : > { %1916 = vmatprep.subr.bf16.mxu0 %v2302_v0  ;;  %v597_v8 = vpack.c.bf16 %v596_v7, %v596_v7  ;;  %s1865_s20 = sshll.u32 %s2417_s25, 7  ;;  %s2310_s25 = smov [#allocation8]  }
  0x75   : > { %s584_s22 = scalar_lea.vmem %s2822_s15, %s2552_s23  ;;  %s2307_s23 = smov 8  }
  0x76   : > { %1913 = vmatmul.mubr.msk.bf16.vlgmr.msra.gmra.mrb[0].mxu0 %vm616_vm1, %v595_v5  ;;  %v598_v25 = vld [vmem:[%s584_s22] sm:$0xff] }
  0x77   : > { %1917 = vmatpush3.bf16.msra.mxu0 %v2105_v4  ;;  %1920 = vmatprep.mubr.msk.bf16.mxu0 %vm2303_vm0, %v2302_v0  ;;  %v599_v26 = vpack.c.bf16 %v598_v25, %v598_v25 }
  0x78   : > { %1918 = vmatprep.subr.bf16.mxu0 %v2302_v0  ;;  %s578_s15 = sand.u32 1, %s2823_s14  }
  0x79   : > { %s1822_s22 = sshll.u32 %s578_s15, 3  ;;  %s1685_s14 = scalar_lea.sflag [#allocation4], %s578_s15 }
  0x7a   : > { %s580_s29 = scalar_lea.vmem [#allocation8], %s1822_s22  ;;  %s2229_s22 = sshll.u32 %s2310_s25, 4  ;;  %s2230_s22 = int_to_ptr.vmem [resolvable:$false] %s2229_s22 }
  0x7b   : > { %1919 = vmatpush3.bf16.msra.mxu0 %v2106_v6  ;;  %s1698_s27 = sshll.u32 %s580_s29, 4  ;;  %s2729_s27 = int_to_ptr.vmem [resolvable:$true] %s1698_s27 }
  0x7c   : > { %1924 = vmatprep.subr.bf16.mxu0 %v2302_v0  ;;  %p2232_p13 = scmp.lt.s32.totalorder %s2729_s27, %s2230_s22 }
  0x7e   : > { %1921 = vmatmul.mubr.msk.bf16.vlgmr.msra.gmra.mrb[4].mxu0 %vm616_vm1, %v597_v8 }
  0x7f   : > { %1928 = vmatprep.mubr.msk.bf16.mxu0 %vm2303_vm0, %v2302_v0  ;;  %1925 = vmatpush3.bf16.msra.mxu0 %v2107_v23 }
  0x80   : > { %1926 = vmatprep.subr.bf16.mxu0 %v2302_v0 }
  0x83   : > { %1927 = vmatpush3.bf16.msra.mxu0 %v2108_v24 }
  0x84   : > { %1938 = vmatprep.subr.bf16.mxu0 %v2302_v0 }
  0x86   : > { %1929 = vmatmul.mubr.msk.bf16.vlgmr.msra.gmra.mrb[8].mxu0 %vm616_vm1, %v599_v26 }
  0x87   : > { %1940 = vmatprep.mubr.msk.bf16.mxu0 %vm2303_vm0, %v2302_v0 }
 0x149   : > { %v654_v9 = vpop.f32.mrb[0].mxu0 }
 0x14a   : > { %v778_v10 = vpack.c.bf16 %v654_v9, %v654_v9  ;;  %v1914_v11 = vpop.f32.mrb[1].mxu0 }
 0x14b   : > { %v657_v12 = vpop.f32.mrb[2].mxu0 }
 0x14c   : > { %958 = vrot.lane.b32.xlu1 %v778_v10, %s2304_s21  ;;  %v1915_v13 = vpop.f32.mrb[3].mxu0 }
 0x151   : > { %v713_v14 = vpop.f32.mrb[4].mxu0 }
 0x152   : > { %1213 = vrot.lane.b32.xlu1 %v713_v14, %s2305_s16  ;;  %921 = vrot.lane.b32.xlu0 %v713_v14, %s2304_s21  ;;  %v1922_v15 = vpop.f32.mrb[5].mxu0 }
 0x153   : > { %v716_v16 = vpop.f32.mrb[6].mxu0 }
 0x154   : > { %v1923_v17 = vpop.f32.mrb[7].mxu0 }
 0x156   : > { %1068 = vrot.lane.b32.xlu0 %v713_v14, %s2306_s18 }
 0x159   : > { %v772_v4 = vpop.f32.mrb[8].mxu0 }
 0x15a   : > { %1104 = vrot.lane.b32.xlu0 %v778_v10, %s2306_s18  ;;  %v1930_v5 = vpop.f32.mrb[9].mxu0  ;;  %v812_v8 = vpack.c.bf16 %v772_v4, %v772_v4 }
 0x15b   : > { %v775_v6 = vpop.f32.mrb[10].mxu0 }
 0x15c   : > { %v1931_v7 = vpop.f32.mrb[11].mxu0  ;;  %v878_v9 = vsel %vm817_vm2, %v812_v8, 0 }
 0x15d   : > { %1939 = vmatpush3.bf16.msra.mxu0 %v878_v9 }
 0x15e   : > { %1249 = vrot.lane.b32.xlu0 %v778_v10, %s2305_s16  ;;  %1950 = vmatprep.subr.bf16.mxu0 %v2302_v0 }
 0x1be   : > { %v959_v20 = vpop.permute.xlu1 %958 }
 0x1c4   : > { %v922_v18 = vpop.permute.xlu0 %921  ;;  %v1214_v22 = vpop.permute.xlu1 %1213 }
 0x1c5   : > { %v2096_v19 = vpack.i.bf16 %v922_v18, %v713_v14 }
 0x1c7   : > { %2097 = vxpose.xlu1.b32.start.end [1/1] (short) (narrow) %v2096_v19, 8 }
 0x1c8   : > { %v1069_v21 = vpop.permute.xlu0 %1068 }
 0x1c9   : > { %1071 = vxpose.xlu0.b32.start.end [1/1] (short) (narrow) %v1069_v21, 8 }
 0x1cc   : > { %v1105_v27 = vpop.permute.xlu0 %1104 }
 0x1cd   : > { %1216 = vxpose.xlu0.b32.start.end [1/1] (short) (narrow) %v1214_v22, 8 }
 0x1d0   : > { %v1250_v32 = vpop.permute.xlu0 %1249 }
 0x247   : > { %v2098_v28 = vpop.trf.xlu1 }
 0x248   : > { %v2102_v29 = vunpack.i.h.bf16 %v2098_v28  ;;  %v2099_v30 = vunpack.i.l.bf16 %v2098_v28 }
 0x249   : > { %v1087_v35 = vpop.trf.xlu0 }
 0x24a   : > { %v811_v31 = vpack.c.bf16 %v2099_v30, %v2099_v30  ;;  %v956_v34 = vpack.c.bf16 %v2102_v29, %v2102_v29  ;;  %v1103_v37 = vpack.c.bf16 %v1087_v35, %v1087_v35 }
 0x24c   : > { %v819_v33 = vsel %vm817_vm2, %v811_v31, 0  ;;  %v964_v36 = vsel %vm817_vm2, %v956_v34, 0  ;;  %v1110_v38 = vsel %vm817_vm2, %v1103_v37, 0 }
 0x24d   : > { %1933 = vmatpush3.bf16.msra.mxu1 %v819_v33  ;;  %v1232_v39 = vpop.trf.xlu0 }
 0x24e   : > { %1944 = vmatprep.subr.bf16.mxu1 %v2302_v0  ;;  %v1248_v40 = vpack.c.bf16 %v1232_v39, %v1232_v39 }
 0x250   : > { %1935 = vmatmul.mubr.msk.bf16.vlgmr.msra.gmra.mrb[0].mxu1 %vm813_vm3, %v778_v10  ;;  %v1255_v41 = vsel %vm817_vm2, %v1248_v40, 0 }
 0x251   : > { %1945 = vmatpush3.bf16.msra.mxu1 %v964_v36  ;;  %1946 = vmatprep.mubr.msk.bf16.mxu1 %vm2303_vm0, %v2302_v0 }
 0x252   : > { %1956 = vmatprep.subr.bf16.mxu1 %v2302_v0 }
 0x258   : > { %1947 = vmatmul.mubr.msk.bf16.vlgmr.msra.gmra.mrb[4].mxu1 %vm813_vm3, %v959_v20 }
 0x259   : > { %1957 = vmatpush3.bf16.msra.mxu1 %v1110_v38  ;;  %1958 = vmatprep.mubr.msk.bf16.mxu1 %vm2303_vm0, %v2302_v0 }
 0x25a   : > { %1968 = vmatprep.subr.bf16.mxu1 %v2302_v0 }
 0x260   : > { %1959 = vmatmul.mubr.msk.bf16.vlgmr.msra.gmra.mrb[8].mxu1 %vm813_vm3, %v1105_v27 }
 0x261   : > { %1969 = vmatpush3.bf16.msra.mxu1 %v1255_v41  ;;  %1970 = vmatprep.mubr.msk.bf16.mxu1 %vm2303_vm0, %v2302_v0 }
 0x262   : > { %1980 = vmatprep.subr.bf16.mxu1 %v2302_v0 }
 0x268   : > { %1971 = vmatmul.mubr.msk.bf16.vlgmr.msra.gmra.mrb[12].mxu1 %vm813_vm3, %v1250_v32 }
 0x269   : > { %1984 = vmatprep.mubr.msk.bf16.mxu1 %vm2303_vm0, %v2302_v0 }
 0x323   : > { %v855_v42 = vpop.f32.mrb[0].mxu1 }
 0x324   : > { %v861_v43 = vmul.f32 0.17677669, %v855_v42  ;;  %v1936_v44 = vpop.f32.mrb[1].mxu1 }
 0x325   : > { %v858_v45 = vpop.f32.mrb[2].mxu1 }
 0x326   : > { %v1937_v46 = vpop.f32.mrb[3].mxu1  ;;  %v862_v47 = vsel %vm813_vm3, %v861_v43, -inf }
 0x327   : > { %863 = vmax.xlane.f32.xlu1 %v862_v47 }
 0x32b   : > { %v1000_v48 = vpop.f32.mrb[4].mxu1 }
 0x32c   : > { %v1006_v49 = vmul.f32 0.17677669, %v1000_v48  ;;  %v1948_v50 = vpop.f32.mrb[5].mxu1 }
 0x32d   : > { %v1003_v51 = vpop.f32.mrb[6].mxu1 }
 0x32e   : > { %v1949_v52 = vpop.f32.mrb[7].mxu1  ;;  %v1007_v53 = vsel %vm813_vm3, %v1006_v49, -inf }
 0x32f   : > { %1008 = vmax.xlane.f32.xlu0 %v1007_v53 }
 0x333   : > { %v1146_v54 = vpop.f32.mrb[8].mxu1 }
 0x334   : > { %v1152_v55 = vmul.f32 0.17677669, %v1146_v54  ;;  %v1960_v56 = vpop.f32.mrb[9].mxu1 }
 0x335   : > { %v1149_v57 = vpop.f32.mrb[10].mxu1  ;;  %v2109_v56 = vld [vmem:[#allocation5] sm:$0xff]  }
 0x336   : > { %v1961_v58 = vpop.f32.mrb[11].mxu1  ;;  %v1153_v59 = vsel %vm813_vm3, %v1152_v55, -inf  ;;  %1981 = vmatpush3.bf16.msra.mxu1 %v2109_v56 }
 0x337   : > { %1154 = vmax.xlane.f32.xlu1 %v1153_v59  ;;  %1982 = vmatprep.subr.bf16.mxu1 %v2302_v0 }
 0x33b   : > { %v1291_v60 = vpop.f32.mrb[12].mxu1 }
 0x33c   : > { %v1297_v61 = vmul.f32 0.17677669, %v1291_v60  ;;  %v1972_v62 = vpop.f32.mrb[13].mxu1 }
 0x33d   : > { %v1294_v63 = vpop.f32.mrb[14].mxu1 }
 0x33e   : > { %v1973_v1 = vpop.f32.mrb[15].mxu1  ;;  %v1298_v2 = vsel %vm813_vm3, %v1297_v61, -inf }
 0x33f   : > { %1299 = vmax.xlane.f32.xlu1 %v1298_v2  ;;  %v2110_v2 = vld [vmem:[#allocation5 + $0x8] sm:$0xff]  }
 0x340   : > { %1983 = vmatpush3.bf16.msra.mxu1 %v2110_v2 }
 0x341   : > { %1996 = vmatprep.subr.bf16.mxu1 %v2302_v0 }
 0x3b4   : > { %v864_v10 = vpop.xlane.xlu1 %863 }
 0x3b5   : > { %v865_v11 = vsub.f32 %v861_v43, %v864_v10 }
 0x3b7   : > { %v866_v12 = vmul.f32 1.442695, %v865_v11 }
 0x3b9   : > { %2121 = vpow2.f32 %v866_v12 }
 0x3bc   : > { %v1009_v13 = vpop.xlane.xlu0 %1008 }
 0x3bd   : > { %v1010_v14 = vsub.f32 %v1006_v49, %v1009_v13 }
 0x3bf   : > { %v1011_v15 = vmul.f32 1.442695, %v1010_v14 }
 0x3c1   : > { %2123 = vpow2.f32 %v1011_v15  ;;  %v1843_v15 = vld [vmem:[%s2777_s7] ss:$0 sm:$0xff] }
 0x3c3   : > { %v2122_v16 = vpop.eup %2121 }
 0x3c4   : > { %v1155_v17 = vpop.xlane.xlu1 %1154  ;;  %v868_v18 = vsel %vm813_vm3, %v2122_v16, 0.0 }
 0x3c5   : > { %v1156_v19 = vsub.f32 %v1152_v55, %v1155_v17  ;;  %869 = vadd.xlane.f32.xlu0 %v868_v18 }
 0x3c7   : > { %v1157_v20 = vmul.f32 1.442695, %v1156_v19 }
 0x3c9   : > { %2125 = vpow2.f32 %v1157_v20 }
 0x3cb   : > { %v2124_v21 = vpop.eup %2123 }
 0x3cc   : > { %v1013_v22 = vsel %vm813_vm3, %v2124_v21, 0.0  ;;  %v1300_v25 = vpop.xlane.xlu1 %1299 }
 0x3cd   : > { %1014 = vadd.xlane.f32.xlu1 %v1013_v22  ;;  %v1301_v26 = vsub.f32 %v1297_v61, %v1300_v25 }
 0x3cf   : > { %v1302_v27 = vmul.f32 1.442695, %v1301_v26 }
 0x3d1   : > { %2127 = vpow2.f32 %v1302_v27 }
 0x3d3   : > { %v2126_v23 = vpop.eup %2125 }
 0x3d4   : > { %v1159_v24 = vsel %vm813_vm3, %v2126_v23, 0.0 }
 0x3d5   : > { %1160 = vadd.xlane.f32.xlu0 %v1159_v24 }
 0x3db   : > { %v2128_v28 = vpop.eup %2127 }
 0x3dc   : > { %v1304_v29 = vsel %vm813_vm3, %v2128_v28, 0.0 }
 0x3de   : > { %1165 = vrot.lane.b32.xlu1 %v812_v8, %s2306_s18  ;;  %s2827_s18 = sld [smem:[#allocation23_spill]] }
 0x3e4   : > { %s2727_s26 = scalar_lea.hbm %s2827_s18, %s1865_s20 }
 0x3eb   : > { %1020 = vrot.lane.b32.xlu0 %v812_v8, %s2304_s21 }
 0x402   : > { %1305 = vadd.xlane.f32.xlu1 %v1304_v29  ;;  %v2113_v29 = vld [vmem:[%s2782_s12] sm:$0xff]  }
 0x413   : > { %1310 = vrot.lane.b32.xlu1 %v812_v8, %s2305_s16 }
 0x452   : > { %v870_v30 = vpop.xlane.xlu0 %869 }
 0x453   : > { %2129 = vrcp.f32 %v870_v30  ;;  %v2114_v30 = vld [vmem:[%s2782_s12 + $0x8] sm:$0xff]  }
 0x45a   : > { %v1015_v31 = vpop.xlane.xlu1 %1014 }
 0x45b   : > { %2131 = vrcp.f32 %v1015_v31  ;;  %v2115_v31 = vld [vmem:[%s2782_s12 + $0x10] sm:$0xff]  }
 0x45d   : > { %v2130_v32 = vpop.eup %2129 }
 0x45e   : > { %v872_v33 = vmul.f32 %v2130_v32, %v2122_v16  ;;  %v1166_v40 = vpop.permute.xlu1 %1165  ;;  %v2116_v32 = vld [vmem:[%s2782_s12 + $0x18] sm:$0xff]  }
 0x45f   : > { %v1171_v42 = vsel %vm817_vm2, %v1166_v40, 0 }
 0x460   : > { %v873_v34 = vpack.c.bf16 %v872_v33, %v872_v33  ;;  %v2117_v33 = vld [vmem:[%s2782_s12 + $0x20] sm:$0xff]  }
 0x462   : > { %v1161_v35 = vpop.xlane.xlu0 %1160  ;;  %1941 = vmatmul.mubr.msk.bf16.vlgmr.msra.gmra.mrb[12].mxu0 %vm813_vm3, %v873_v34  ;;  %v2118_v34 = vld [vmem:[%s2782_s12 + $0x28] sm:$0xff]  }
 0x463   : > { %2133 = vrcp.f32 %v1161_v35  ;;  %1952 = vmatprep.mubr.msk.bf16.mxu0 %vm2303_vm0, %v2302_v0 }
 0x465   : > { %v2132_v36 = vpop.eup %2131 }
 0x466   : > { %v1017_v37 = vmul.f32 %v2132_v36, %v2124_v21  ;;  %v1021_v38 = vpop.permute.xlu0 %1020 }
 0x467   : > { %v1026_v39 = vsel %vm817_vm2, %v1021_v38, 0 }
 0x468   : > { %1951 = vmatpush3.bf16.msra.mxu0 %v1026_v39  ;;  %v1018_v41 = vpack.c.bf16 %v1017_v37, %v1017_v37  ;;  %v1847_v39 = vld [vmem:[%s2778_s8] ss:$0 sm:$0xff] }
 0x469   : > { %1962 = vmatprep.subr.bf16.mxu0 %v2302_v0 }
 0x46b   : > { %1953 = vmatmul.mubr.msk.bf16.vlgmr.msra.gmra.mrb[16].mxu0 %vm813_vm3, %v1018_v41  ;;  %v1848_v41 = vld [vmem:[#allocation7] ss:$0 sm:$0xff] }
 0x46c   : > { %1963 = vmatpush3.bf16.msra.mxu0 %v1171_v42  ;;  %1964 = vmatprep.mubr.msk.bf16.mxu0 %vm2303_vm0, %v2302_v0 }
 0x46d   : > { %v2134_v43 = vpop.eup %2133  ;;  %1974 = vmatprep.subr.bf16.mxu0 %v2302_v0 }
 0x46e   : > { %v1163_v44 = vmul.f32 %v2134_v43, %v2126_v23 }
 0x470   : > { %v1164_v45 = vpack.c.bf16 %v1163_v44, %v1163_v44 }
 0x473   : > { %1965 = vmatmul.mubr.msk.bf16.vlgmr.msra.gmra.mrb[20].mxu0 %vm813_vm3, %v1164_v45  ;;  %v2119_v45 = vld [vmem:[%s2782_s12 + $0x30] sm:$0xff]  }
 0x474   : > { %1976 = vmatprep.mubr.msk.bf16.mxu0 %vm2303_vm0, %v2302_v0 }
 0x48f   : > { %v1306_v46 = vpop.xlane.xlu1 %1305 }
 0x490   : > { %2135 = vrcp.f32 %v1306_v46  ;;  %v2120_v46 = vld [vmem:[%s2782_s12 + $0x38] sm:$0xff]  }
 0x493   : > { %v1311_v47 = vpop.permute.xlu1 %1310 }
 0x494   : > { %v1316_v48 = vsel %vm817_vm2, %v1311_v47, 0  ;;  %v1849_v47 = vld [vmem:[%s2781_s11] ss:$0 sm:$0xff] }
 0x495   : > { %1975 = vmatpush3.bf16.msra.mxu0 %v1316_v48 }
 0x496   : > { %1988 = vmatprep.subr.bf16.mxu0 %v2302_v0 }
 0x49a   : > { %v2136_v49 = vpop.eup %2135 }
 0x49b   : > { %v1308_v50 = vmul.f32 %v2136_v49, %v2128_v28  ;;  %v2111_v28 = vld [vmem:[%s2780_s10] sm:$0xff]  }
 0x49d   : > { %v1309_v51 = vpack.c.bf16 %v1308_v50, %v1308_v50 }
 0x49f   : > { %1977 = vmatmul.mubr.msk.bf16.vlgmr.msra.gmra.mrb[24].mxu0 %vm813_vm3, %v1309_v51 }
 0x4a0   : > { %1992 = vmatprep.mubr.msk.bf16.mxu0 %vm2303_vm0, %v2302_v0  ;;  %1989 = vmatpush3.bf16.msra.mxu0 %v2111_v28 }
 0x4a1   : > { %1990 = vmatprep.subr.bf16.mxu0 %v2302_v0 }
 0x535   : > { %v914_v52 = vpop.f32.mrb[12].mxu0 }
 0x536   : > { %v1942_v53 = vpop.f32.mrb[13].mxu0 }
 0x537   : > { %v917_v54 = vpop.f32.mrb[14].mxu0 }
 0x538   : > { %v1943_v55 = vpop.f32.mrb[15].mxu0 }
 0x53e   : > { %v1062_v57 = vpop.f32.mrb[16].mxu0 }
 0x53f   : > { %1359 = vrot.lane.b32.xlu0 %v1062_v57, %s2307_s23  ;;  %v1954_v58 = vpop.f32.mrb[17].mxu0  ;;  %s2824_s23 = sld [smem:[#allocation18_spill]] }
 0x540   : > { %v1065_v59 = vpop.f32.mrb[18].mxu0 }
 0x541   : > { %v1955_v60 = vpop.f32.mrb[19].mxu0 }
 0x545   : > { %p2828_p7 = scmp.ne.s32.totalorder %s2824_s23, 0 }
 0x546   : > { %v1207_v61 = vpop.f32.mrb[20].mxu0 }
 0x547   : > { %1363 = vrot.lane.b32.xlu1 %v1207_v61, %s2308_s0  ;;  %v1966_v62 = vpop.f32.mrb[21].mxu0  ;;  %s2225_s0 = scalar_lea.vmem %s2729_s27, 128 }
 0x548   : > { %v1210_v63 = vpop.f32.mrb[22].mxu0  ;;  %p2226_p12 = scmp.ne.s32.totalorder %s2729_s27, %s2225_s0 }
 0x549   : > { %v1967_v1 = vpop.f32.mrb[23].mxu0 }
 0x54a   : > { %p2227_p8 = pnand %p2226_p12, %p2828_p7 }
 0x54c   : > { %p2228_p11 = pneg %p2227_p8 }
 0x572   : > { %v1352_v4 = vpop.f32.mrb[24].mxu0 }
 0x573   : > { %1367 = vrot.lane.b32.xlu0 %v1352_v4, %s2309_s17  ;;  %v1978_v5 = vpop.f32.mrb[25].mxu0  ;;  %s2231_s17 = scalar_lea.vmem %s2230_s22, 256 }
 0x574   : > { %v1355_v6 = vpop.f32.mrb[26].mxu0  ;;  %p2233_p1 = scmp.lt.s32.totalorder %s2231_s17, %s2225_s0 }
 0x575   : > { %v1979_v7 = vpop.f32.mrb[27].mxu0 }
 0x576   : > { %p2234_p6 = por %p2233_p1, %p2232_p13 }
 0x578   : > { %p2235_p9 = pnand %p2234_p6, %p2228_p11 }
 0x5b1   : > { %v1360_v8 = vpop.permute.xlu0 %1359 }
 0x5b2   : > { %v1370_v10 = vsel %vm813_vm3, %v914_v52, %v1360_v8 }
 0x5b9   : > { %v1364_v9 = vpop.permute.xlu1 %1363 }
 0x5ba   : > { %v1372_v11 = vsel %vm1371_vm4, %v1370_v10, %v1364_v9  ;;  %v1862_v9 = vld [vmem:[%s2825_s19] ss:$0 sm:$0xff] }
 0x5e5   : > { %v1368_v12 = vpop.permute.xlu0 %1367 }
 0x5e6   : > { %v1374_v13 = vsel %vm1373_vm5, %v1372_v11, %v1368_v12  ;;  %v1863_v11 = vld [vmem:[%s2826_s24] ss:$0 sm:$0xff] }
 0x5e7   : > { %v1375_v14 = vpack.c.bf16 %v1374_v13, %v1374_v13 }
 0x5e9   : > { %1985 = vmatmul.mubr.msk.bf16.vlgmr.msra.gmra.mrb[16].mxu1 %vm616_vm1, %v1375_v14 }
 0x5ea   : > { %2012 = vmatprep.mubr.msk.bf16.mxu1 %vm2303_vm0, %v2302_v0  ;;  %1997 = vmatpush3.bf16.msra.mxu1 %v2113_v29 }
 0x5eb   : > { %1998 = vmatprep.subr.bf16.mxu1 %v2302_v0 }
 0x5ee   : > { %1999 = vmatpush3.bf16.msra.mxu1 %v2114_v30 }
 0x5ef   : > { %2000 = vmatprep.subr.bf16.mxu1 %v2302_v0 }
 0x5f2   : > { %2001 = vmatpush3.bf16.msra.mxu1 %v2115_v31 }
 0x5f3   : > { %2002 = vmatprep.subr.bf16.mxu1 %v2302_v0 }
 0x5f6   : > { %2003 = vmatpush3.bf16.msra.mxu1 %v2116_v32 }
 0x5f7   : > { %2004 = vmatprep.subr.bf16.mxu1 %v2302_v0 }
 0x5fa   : > { %2005 = vmatpush3.bf16.msra.mxu1 %v2117_v33 }
 0x5fb   : > { %2006 = vmatprep.subr.bf16.mxu1 %v2302_v0 }
 0x5fe   : > { %2007 = vmatpush3.bf16.msra.mxu1 %v2118_v34 }
 0x5ff   : > { %2008 = vmatprep.subr.bf16.mxu1 %v2302_v0 }
 0x602   : > { %2009 = vmatpush3.bf16.msra.mxu1 %v2119_v45 }
 0x603   : > { %2010 = vmatprep.subr.bf16.mxu1 %v2302_v0  ;;  %v1853_v0 = vld [vmem:[%s2783_s13] ss:$0 sm:$0xff] }
 0x606   : > { %2011 = vmatpush3.bf16.msra.mxu1 %v2120_v46 }
 0x6bc   : > { %v1436_v16 = vpop.f32.mrb[16].mxu1 }
 0x6bd   : > { %v1437_v17 = vadd.f32 %v1843_v15, %v1436_v16  ;;  %v1986_v18 = vpop.f32.mrb[17].mxu1 }
 0x6be   : > { %v1439_v19 = vpop.f32.mrb[18].mxu1 }
 0x6bf   : > { %v1987_v20 = vpop.f32.mrb[19].mxu1  ;;  %v1442_v21 = vadd.f32 %v1437_v17, %v2564_v3  ;;  %v2112_v3 = vld [vmem:[%s2780_s10 + $0x8] sm:$0xff]  }
 0x6c0   : > { %1991 = vmatpush3.bf16.msra.mxu0 %v2112_v3 }
 0x6c1   : > { %v1445_v22 = vsel %vm616_vm1, %v1442_v21, 0.0 }
 0x6c2   : > { %1446 = vadd.xlane.f32.xlu1 %v1445_v22 }
 0x74f   : > { %v1447_v23 = vpop.xlane.xlu1 %1446 }
 0x750   : > { %v1449_v24 = vmul.f32 0.03125, %v1447_v23 }
 0x752   : > { %v1450_v25 = vsub.f32 %v1442_v21, %v1449_v24 }
 0x754   : > { %v1451_v26 = vmul.f32 %v1450_v25, %v1450_v25 }
 0x756   : > { %v1452_v27 = vsel %vm616_vm1, %v1451_v26, 0.0 }
 0x757   : > { %1453 = vadd.xlane.f32.xlu0 %v1452_v27 }
 0x7e4   : > { %v1454_v35 = vpop.xlane.xlu0 %1453 }
 0x7e5   : > { %v1455_v36 = vmul.f32 0.03125, %v1454_v35 }
 0x7e7   : > { %v1456_v37 = vadd.f32 1e-05, %v1455_v36 }
 0x7e9   : > { %2137 = vrsqrt.f32 %v1456_v37 }
 0x7f3   : > { %v2138_v38 = vpop.eup %2137 }
 0x7f4   : > { %v1458_v40 = vmul.f32 %v2138_v38, %v1450_v25 }
 0x7f6   : > { %v1465_v42 = vmul.f32 %v1847_v39, %v1458_v40 }
 0x7f8   : > { %v1472_v43 = vadd.f32 %v1848_v41, %v1465_v42 }
 0x7fa   : > { %v1473_v44 = vpack.c.bf16 %v1472_v43, %v1472_v43 }
 0x7fc   : > { %1993 = vmatmul.mubr.msk.bf16.vlgmr.msra.gmra.mrb[28].mxu0 %vm616_vm1, %v1473_v44 }
 0x8cf   : > { %v1534_v48 = vpop.f32.mrb[28].mxu0 }
 0x8d0   : > { %v1535_v49 = vadd.f32 %v1849_v47, %v1534_v48  ;;  %v1994_v50 = vpop.f32.mrb[29].mxu0 }
 0x8d1   : > { %v1537_v51 = vpop.f32.mrb[30].mxu0 }
 0x8d2   : > { %v1540_v52 = vmax.f32 %v1535_v49, 0.0  ;;  %v1995_v53 = vpop.f32.mrb[31].mxu0 }
 0x8d4   : > { %v1541_v54 = vpack.c.bf16 %v1540_v52, %v1540_v52 }
 0x8d6   : > { %2013 = vmatmul.mubr.bf16.vlgmr.msra.gmra.mrb[20].mxu1 %v1541_v54 }
 0x9a9   : > { %v1647_v55 = vpop.f32.mrb[20].mxu1 }
 0x9aa   : > { %v1648_v56 = vadd.f32 %v1853_v0, %v1647_v55  ;;  %v2014_v57 = vpop.f32.mrb[21].mxu1 }
 0x9ab   : > { %v1650_v58 = vpop.f32.mrb[22].mxu1 }
 0x9ac   : > { %v2015_v59 = vpop.f32.mrb[23].mxu1  ;;  %v1653_v60 = vadd.f32 %v1648_v56, %v1472_v43 }
 0x9ae   : > { %v1656_v61 = vsel %vm616_vm1, %v1653_v60, 0.0 }
 0x9af   : > { %1657 = vadd.xlane.f32.xlu0 %v1656_v61 }
 0xa3c   : > { %v1658_v62 = vpop.xlane.xlu0 %1657 }
 0xa3d   : > { %v1659_v63 = vmul.f32 0.03125, %v1658_v62 }
 0xa3f   : > { %v1660_v1 = vsub.f32 %v1653_v60, %v1659_v63 }
 0xa41   : > { %v1661_v2 = vmul.f32 %v1660_v1, %v1660_v1 }
 0xa43   : > { %v1662_v4 = vsel %vm616_vm1, %v1661_v2, 0.0 }
 0xa44   : > { %1663 = vadd.xlane.f32.xlu1 %v1662_v4 }
 0xad1   : > { %v1664_v5 = vpop.xlane.xlu1 %1663 }
 0xad2   : > { %v1665_v6 = vmul.f32 0.03125, %v1664_v5 }
 0xad4   : > { %v1666_v7 = vadd.f32 1e-05, %v1665_v6 }
 0xad6   : > { %2139 = vrsqrt.f32 %v1666_v7 }
 0xae0   : > { %v2140_v8 = vpop.eup %2139 }
 0xae1   : > { %v1668_v10 = vmul.f32 %v2140_v8, %v1660_v1 }
 0xae3   : > { %v1675_v12 = vmul.f32 %v1862_v9, %v1668_v10 }
 0xae5   : > { %v1682_v13 = vadd.f32 %v1863_v11, %v1675_v12 }
 0xae7   : > { %1683 = vst.msk [vmem:[%s580_s29] sm:$0xff] %vm616_vm1, %v1682_v13 }
 0xae8   : > { %2238 = shalt.err (!%p2235_p9)
}
 0xae9   : > { %s2239_s15 = scalar_lea.hbm %s2727_s26, 128  ;;  %s2243_s30 = scalar_lea.hbm %s2827_s18, 256 }
 0xaea   : > { %p2240_p2 = scmp.ne.s32.totalorder %s2727_s26, %s2239_s15  ;;  %p2244_p4 = scmp.lt.u32.totalorder %s2727_s26, %s2827_s18 }
 0xaeb   : > { %p2245_p5 = scmp.lt.u32.totalorder %s2243_s30, %s2239_s15  ;;  %p2247_p12 = scmp.lt.u32.totalorder %s2239_s15, %s2727_s26 }
 0xaec   : > { %p2241_p3 = pnand %p2240_p2, %p2828_p7 }
 0xaed   : > { %p2246_p10 = por %p2245_p5, %p2244_p4 }
 0xaee   : > { %p2242_p0 = pneg %p2241_p3 }
 0xaef   : > { %p2248_p8 = por %p2247_p12, %p2246_p10 }
 0xaf1   : > { %p2249_p11 = pnand %p2248_p8, %p2242_p0 }
 0xaf3   : > { %2252 = shalt.err (!%p2249_p11)
}
 0xaf4   : > { %2028 = dma.vmem_to_hbm [thread:$0]  (%p2828_p7), %s2729_s27, 128, %s2727_s26, %s1685_s14  }
 0xaf5 PF: > { %s2829_s29 = sld [smem:[#allocation15_spill]]  ;;  %s2830_s21 = sld [smem:[#allocation12_spill]] }
 0xaf6   : > { %s2831_s16 = sld [smem:[#allocation19_spill]] }
 0xafb   : > { %p2050_p13 = scmp.ge.s32.totalorder %s2829_s29, 2  ;;  %s1710_s0 = sand.u32 1, %s2830_s21  }
 0xafc   : > { %p2832_p1 = scmp.ne.s32.totalorder %s2831_s16, 0  ;;  %s1711_s25 = scalar_lea.sflag [#allocation4], %s1710_s0 }
 0xafe   : > { %p2041_p6 = pnand %p2050_p13, %p2832_p1 }
 0xb00   : > { %2278 = dma.done.wait (!%p2041_p6), %s1711_s25, 128  }
 0xb01   : > { %2280 = vsyncadd (!%p2041_p6), %s1711_s25, 4294967168  ;;  %s2833_s24 = sld [smem:[#allocation16_spill]]  ;;  %s2834_s21 = sld [smem:[#allocation13_spill]] }
 0xb02   : > { %s2835_s22 = sld [smem:[#allocation14_spill]]  ;;  %s2836_s23 = sld [smem:[#allocation17_spill]] }
 0xb07   : > { %p28_p9 = scmp.ge.s32.totalorder %s2833_s24, 4  }
 0xb09   :  { %30 = sbr.rel (!%p28_p9) target bundleno = 10 (0xa), region = 138 }
 0xb10   :  { %1716 = vsyncpa [#allocation3], 1 }
 0xb11   :  { %1718 = vsyncpa [#allocation3 + $0x1], 1 }
 0xb12   :  { %1719 = vsyncpa [#allocation6], 1 }
 0xb13   :  { %1720 = vsyncpa [#allocation4], 1 }
 0xb14   :  { %1722 = vsyncpa [#allocation4 + $0x1], 1 }

</bundles_post_ra>
